<compile_context>
chip_gen: v7x
topology: tpu7x:2x2x1
jax: 0.10.0
libtpu: 0.0.40
codegen_flags: <defaults>
</compile_context>

<pallas_src>
import functools

import jax
import jax.numpy as jnp
from jax.experimental import pallas as pl
from jax.experimental.pallas import tpu as pltpu


def _round_up(x, m):
    return ((x + m - 1) // m) * m


def _mlp_projection_kernel(x_ref, w1_ref, b1_ref, w2_ref, b2_ref, w3_ref, b3_ref,
                           o_ref, *, compute_dtype):
    """Fused Linear+ReLU -> Linear+ReLU -> Linear on one batch tile.

    Matmul operands are in `compute_dtype`; accumulation is f32 (biases are f32 and
    added to the f32 accumulator). Rows are independent, so any padded rows in the
    ragged last block produce garbage that Pallas drops on the masked write.
    """
    x = x_ref[...].astype(compute_dtype)  # cast in-kernel: no extra HBM pass over x

    h1 = jnp.dot(x, w1_ref[...], preferred_element_type=jnp.float32) + b1_ref[...]
    h1 = jnp.maximum(h1, 0.0).astype(compute_dtype)

    h2 = jnp.dot(h1, w2_ref[...], preferred_element_type=jnp.float32) + b2_ref[...]
    h2 = jnp.maximum(h2, 0.0).astype(compute_dtype)

    out = jnp.dot(h2, w3_ref[...], preferred_element_type=jnp.float32) + b3_ref[...]
    o_ref[...] = out.astype(o_ref.dtype)


@functools.partial(jax.jit, static_argnames=("block_b", "compute_dtype", "out_dtype"))
def mlp_projection(x, params, *, block_b=1024, compute_dtype=jnp.bfloat16,
                   out_dtype=None):
    """params = (w1, b1, w2, b2, w3, b3); w_i are [in, out], b_i are [1, out].

    compute_dtype: MXU operand dtype (default bf16, f32 accumulation kept).
    out_dtype:     output dtype (default: x.dtype).
    """
    w1, b1, w2, b2, w3, b3 = params
    B, d_in = x.shape
    d_hidden = w1.shape[1]
    d_out = w3.shape[1]
    cdt = jnp.dtype(compute_dtype)
    odt = jnp.dtype(out_dtype) if out_dtype is not None else jnp.dtype(x.dtype)

    # Batch tile: clamp for small batches, keep a multiple of 8 sublanes, and when
    # the batch is big enough make sure there are >= 2 grid tiles (v7x: 2 TCs).
    eff_block = min(block_b, _round_up(B, 8))
    eff_block = max(8, _round_up(eff_block, 8))
    if B >= 16 and pl.cdiv(B, eff_block) < 2:
        eff_block = max(8, _round_up(pl.cdiv(B, 2), 8))
    grid = (pl.cdiv(B, eff_block),)

    # Weights in compute dtype (one-off, tiny); biases kept f32 for the f32 acc.
    w1c, w2c, w3c = (w.astype(cdt) for w in (w1, w2, w3))
    b1f, b2f, b3f = (b.astype(jnp.float32) for b in (b1, b2, b3))

    full = lambda shape: pl.BlockSpec(shape, lambda i: (0, 0))

    # --- derived VMEM budget (double-buffered inputs/outputs + f32 intermediates) ---
    x_item = jnp.dtype(x.dtype).itemsize
    c_item = cdt.itemsize
    o_item = odt.itemsize
    w_elems = d_in * d_hidden + d_hidden * d_hidden + d_hidden * d_out
    b_elems = 2 * d_hidden + d_out
    vmem_bytes = (
        2 * (w_elems * c_item + b_elems * 4)                 # weights + biases (x2 buf)
        + 2 * eff_block * d_in * x_item                      # x tile (x2 buf)
        + 2 * eff_block * d_out * o_item                     # out tile (x2 buf)
        + eff_block * (2 * d_hidden + d_out) * 4             # f32 accumulators
        + eff_block * 2 * d_hidden * c_item                  # cast ReLU intermediates
    )
    vmem_limit = min(int(vmem_bytes * 1.5) + (4 << 20), 48 << 20)

    # --- advisory cost estimate (rows actually swept, real per-stream itemsizes) ---
    rows = grid[0] * eff_block
    flops = 2 * rows * (d_in * d_hidden + d_hidden * d_hidden + d_hidden * d_out)
    bytes_accessed = (
        rows * d_in * x_item + rows * d_out * o_item
        + w_elems * c_item + b_elems * 4
    )

    kernel = functools.partial(_mlp_projection_kernel, compute_dtype=cdt)

    out = pl.pallas_call(
        kernel,
        out_shape=jax.ShapeDtypeStruct((B, d_out), odt),
        grid_spec=pltpu.PrefetchScalarGridSpec(
            num_scalar_prefetch=0,
            grid=grid,
            in_specs=[
                pl.BlockSpec((eff_block, d_in), lambda i: (i, 0)),  # x tile (streamed)
                full((d_in, d_hidden)),      # w1
                full((1, d_hidden)),         # b1
                full((d_hidden, d_hidden)),  # w2
                full((1, d_hidden)),         # b2
                full((d_hidden, d_out)),     # w3
                full((1, d_out)),            # b3
            ],
            out_specs=pl.BlockSpec((eff_block, d_out), lambda i: (i, 0)),
        ),
        compiler_params=pltpu.CompilerParams(
            dimension_semantics=("parallel",),
            vmem_limit_bytes=vmem_limit,
        ),
        cost_estimate=pl.CostEstimate(
            flops=flops, transcendentals=0, bytes_accessed=bytes_accessed),
    )(x, w1c, b1f, w2c, b2f, w3c, b3f)

    return out


def init_mlp_projection_params(key, input_dim, output_dim=128, hidden_dim=256,
                               dtype=jnp.float32):
    """Deterministic init mimicking PyTorch nn.Linear default U(-1/sqrt(fan_in), +)."""
    def linear(k, fan_in, fan_out):
        kw, kb = jax.random.split(k)
        bound = 1.0 / (fan_in ** 0.5)
        w = jax.random.uniform(kw, (fan_in, fan_out), dtype, -bound, bound)
        b = jax.random.uniform(kb, (1, fan_out), dtype, -bound, bound)
        return w, b

    k1, k2, k3 = jax.random.split(key, 3)
    w1, b1 = linear(k1, input_dim, hidden_dim)
    w2, b2 = linear(k2, hidden_dim, hidden_dim)
    w3, b3 = linear(k3, hidden_dim, output_dim)
    return (w1, b1, w2, b2, w3, b3)


def mlp_projection_ref(x, params):
    """Pure-JAX reference of the PyTorch forward (num_layers == 3 path)."""
    # TODO(synk): the num_layers == 2 configuration (layer1 -> layer3) is not exposed
    # by this kernel; only the default 3-layer forward is implemented.
    w1, b1, w2, b2, w3, b3 = params
    h = jnp.maximum(x @ w1 + b1, 0.0)
    h = jnp.maximum(h @ w2 + b2, 0.0)
    return h @ w3 + b3


if __name__ == "__main__":
    # Shapes consistent with the module defaults: hidden=256, out=128; small input_dim.
    D_IN, D_HID, D_OUT = 32, 256, 128

    key = jax.random.PRNGKey(0)
    kx, kp, kx2 = jax.random.split(key, 3)
    params = init_mlp_projection_params(kp, D_IN, output_dim=D_OUT, hidden_dim=D_HID)

    # Small-batch test, default bf16 MXU path (looser tolerance vs f32 reference).
    B = 16
    x = jax.random.normal(kx, (B, D_IN), jnp.float32)
    out = jax.block_until_ready(mlp_projection(x, params))
    ref = mlp_projection_ref(x, params)
    assert out.shape == (B, D_OUT), out.shape
    err = float(jnp.max(jnp.abs(out.astype(jnp.float32) - ref)))
    assert err < 5e-2, err

    # f32 compute path must match the reference tightly.
    out_f32 = jax.block_until_ready(
        mlp_projection(x, params, compute_dtype=jnp.float32))
    assert jnp.allclose(out_f32, ref, atol=1e-4, rtol=1e-4), \
        float(jnp.max(jnp.abs(out_f32 - ref)))

    # Ragged larger-batch test: exercises the >=2-tile split + masked partial block.
    B2 = 300
    x2 = jax.random.normal(kx2, (B2, D_IN), jnp.float32)
    out2 = jax.block_until_ready(mlp_projection(x2, params, block_b=1024))
    ref2 = mlp_projection_ref(x2, params)
    assert out2.shape == (B2, D_OUT), out2.shape
    err2 = float(jnp.max(jnp.abs(out2.astype(jnp.float32) - ref2)))
    assert err2 < 5e-2, err2

    print("KERNEL_OK")
</pallas_src>

<mosaic_0001>
module attributes {stable_mosaic.version = 11 : i64} {
  func.func @_mlp_projection_kernel(%arg0: i32, %arg1: memref<8x32xf32, #tpu.memory_space<vmem>>, %arg2: memref<32x256xbf16, #tpu.memory_space<vmem>>, %arg3: memref<1x256xf32, #tpu.memory_space<vmem>>, %arg4: memref<256x256xbf16, #tpu.memory_space<vmem>>, %arg5: memref<1x256xf32, #tpu.memory_space<vmem>>, %arg6: memref<256x128xbf16, #tpu.memory_space<vmem>>, %arg7: memref<1x128xf32, #tpu.memory_space<vmem>>, %arg8: memref<8x128xf32, #tpu.memory_space<vmem>>) attributes {dimension_semantics = [#tpu.dimension_semantics<parallel>], iteration_bounds = array<i64: 2>, scalar_prefetch = 0 : i64, scratch_operands = 0 : i64, tpu.core_type = #tpu.core_type<tc>, window_params = [{transform_indices = @transform_0, window_bounds = array<i64: 8, 32>}, {pipeline_mode = #tpu.pipeline_mode<synchronous>, transform_indices = @transform_1, window_bounds = array<i64: 32, 256>}, {pipeline_mode = #tpu.pipeline_mode<synchronous>, transform_indices = @transform_2, window_bounds = array<i64: 1, 256>}, {pipeline_mode = #tpu.pipeline_mode<synchronous>, transform_indices = @transform_3, window_bounds = array<i64: 256, 256>}, {pipeline_mode = #tpu.pipeline_mode<synchronous>, transform_indices = @transform_4, window_bounds = array<i64: 1, 256>}, {pipeline_mode = #tpu.pipeline_mode<synchronous>, transform_indices = @transform_5, window_bounds = array<i64: 256, 128>}, {pipeline_mode = #tpu.pipeline_mode<synchronous>, transform_indices = @transform_6, window_bounds = array<i64: 1, 128>}, {transform_indices = @transform_7, window_bounds = array<i64: 8, 128>}]} {
    %c0 = arith.constant 0 : index
    %c0_0 = arith.constant 0 : index
    %0 = vector.load %arg1[%c0, %c0_0] : memref<8x32xf32, #tpu.memory_space<vmem>>, vector<8x32xf32>
    %1 = arith.truncf %0 : vector<8x32xf32> to vector<8x32xbf16>
    %c0_1 = arith.constant 0 : index
    %c0_2 = arith.constant 0 : index
    %2 = vector.load %arg2[%c0_1, %c0_2] : memref<32x256xbf16, #tpu.memory_space<vmem>>, vector<32x256xbf16>
    %cst = arith.constant dense<0.000000e+00> : vector<8x256xf32>
    %3 = tpu.matmul %1, %2, %cst {dimension_numbers = #tpu.dot_dimension_numbers<[1], [0], [0], [1], [0, 0, 1, 1], [], []>} : vector<8x32xbf16>, vector<32x256xbf16>, vector<8x256xf32> -> vector<8x256xf32>
    %c0_3 = arith.constant 0 : index
    %c0_4 = arith.constant 0 : index
    %4 = vector.load %arg3[%c0_3, %c0_4] : memref<1x256xf32, #tpu.memory_space<vmem>>, vector<1x256xf32>
    %5 = vector.broadcast %4 : vector<1x256xf32> to vector<8x256xf32>
    %6 = arith.addf %3, %5 : vector<8x256xf32>
    %cst_5 = arith.constant 0.000000e+00 : f32
    %7 = vector.broadcast %cst_5 : f32 to vector<8x256xf32>
    %8 = arith.maximumf %6, %7 : vector<8x256xf32>
    %9 = arith.truncf %8 : vector<8x256xf32> to vector<8x256xbf16>
    %c0_6 = arith.constant 0 : index
    %c0_7 = arith.constant 0 : index
    %10 = vector.load %arg4[%c0_6, %c0_7] : memref<256x256xbf16, #tpu.memory_space<vmem>>, vector<256x256xbf16>
    %cst_8 = arith.constant dense<0.000000e+00> : vector<8x256xf32>
    %11 = tpu.matmul %9, %10, %cst_8 {dimension_numbers = #tpu.dot_dimension_numbers<[1], [0], [0], [1], [0, 0, 1, 1], [], []>} : vector<8x256xbf16>, vector<256x256xbf16>, vector<8x256xf32> -> vector<8x256xf32>
    %c0_9 = arith.constant 0 : index
    %c0_10 = arith.constant 0 : index
    %12 = vector.load %arg5[%c0_9, %c0_10] : memref<1x256xf32, #tpu.memory_space<vmem>>, vector<1x256xf32>
    %13 = vector.broadcast %12 : vector<1x256xf32> to vector<8x256xf32>
    %14 = arith.addf %11, %13 : vector<8x256xf32>
    %cst_11 = arith.constant 0.000000e+00 : f32
    %15 = vector.broadcast %cst_11 : f32 to vector<8x256xf32>
    %16 = arith.maximumf %14, %15 : vector<8x256xf32>
    %17 = arith.truncf %16 : vector<8x256xf32> to vector<8x256xbf16>
    %c0_12 = arith.constant 0 : index
    %c0_13 = arith.constant 0 : index
    %18 = vector.load %arg6[%c0_12, %c0_13] : memref<256x128xbf16, #tpu.memory_space<vmem>>, vector<256x128xbf16>
    %cst_14 = arith.constant dense<0.000000e+00> : vector<8x128xf32>
    %19 = tpu.matmul %17, %18, %cst_14 {dimension_numbers = #tpu.dot_dimension_numbers<[1], [0], [0], [1], [0, 0, 1, 1], [], []>} : vector<8x256xbf16>, vector<256x128xbf16>, vector<8x128xf32> -> vector<8x128xf32>
    %c0_15 = arith.constant 0 : index
    %c0_16 = arith.constant 0 : index
    %20 = vector.load %arg7[%c0_15, %c0_16] : memref<1x128xf32, #tpu.memory_space<vmem>>, vector<1x128xf32>
    %21 = vector.broadcast %20 : vector<1x128xf32> to vector<8x128xf32>
    %22 = arith.addf %19, %21 : vector<8x128xf32>
    %c0_17 = arith.constant 0 : index
    %c0_18 = arith.constant 0 : index
    %23 = vector.load %arg8[%c0_17, %c0_18] : memref<8x128xf32, #tpu.memory_space<vmem>>, vector<8x128xf32>
    tpu.vector_store %arg8[%c0_17, %c0_18], %22 {strides = array<i32>} : memref<8x128xf32, #tpu.memory_space<vmem>>, vector<8x128xf32>,
    return
  }
  func.func @transform_0(%arg0: i32) -> (i32, i32) {
    %c0_i32 = arith.constant 0 : i32
    %c0_i32_0 = arith.constant 0 : i32
    return %arg0, %c0_i32 : i32, i32
  }
  func.func @transform_1(%arg0: i32) -> (i32, i32) {
    %c0_i32 = arith.constant 0 : i32
    %c0_i32_0 = arith.constant 0 : i32
    %c0_i32_1 = arith.constant 0 : i32
    return %c0_i32, %c0_i32_0 : i32, i32
  }
  func.func @transform_2(%arg0: i32) -> (i32, i32) {
    %c0_i32 = arith.constant 0 : i32
    %c0_i32_0 = arith.constant 0 : i32
    %c0_i32_1 = arith.constant 0 : i32
    return %c0_i32, %c0_i32_0 : i32, i32
  }
  func.func @transform_3(%arg0: i32) -> (i32, i32) {
    %c0_i32 = arith.constant 0 : i32
    %c0_i32_0 = arith.constant 0 : i32
    %c0_i32_1 = arith.constant 0 : i32
    return %c0_i32, %c0_i32_0 : i32, i32
  }
  func.func @transform_4(%arg0: i32) -> (i32, i32) {
    %c0_i32 = arith.constant 0 : i32
    %c0_i32_0 = arith.constant 0 : i32
    %c0_i32_1 = arith.constant 0 : i32
    return %c0_i32, %c0_i32_0 : i32, i32
  }
  func.func @transform_5(%arg0: i32) -> (i32, i32) {
    %c0_i32 = arith.constant 0 : i32
    %c0_i32_0 = arith.constant 0 : i32
    %c0_i32_1 = arith.constant 0 : i32
    return %c0_i32, %c0_i32_0 : i32, i32
  }
  func.func @transform_6(%arg0: i32) -> (i32, i32) {
    %c0_i32 = arith.constant 0 : i32
    %c0_i32_0 = arith.constant 0 : i32
    %c0_i32_1 = arith.constant 0 : i32
    return %c0_i32, %c0_i32_0 : i32, i32
  }
  func.func @transform_7(%arg0: i32) -> (i32, i32) {
    %c0_i32 = arith.constant 0 : i32
    %c0_i32_0 = arith.constant 0 : i32
    return %arg0, %c0_i32 : i32, i32
  }
}

</mosaic_0001>

<bundles_post_ra>
// kernel: mlp_projection.1
= control target key start
LH: loop header
LB: loop body
LE: loop exit
PB: predicated region body
PF: predicated region fallthrough
CT: control target
= control target key end

     0   :  { %12 = vsyncpa [#allocation3], 0  ;;  %s1427_s0 = inlined_call_operand.vmem [shape: f32[16,32], index: 0, kind: input, shape index: {}]   ;;  %s1428_s1 = inlined_call_operand.vmem [shape: bf16[32,256], index: 1, kind: input, shape index: {}]   ;;  %s1429_s2 = inlined_call_operand.vmem [shape: f32[1,256], index: 2, kind: input, shape index: {}]   ;;  %s1430_s3 = inlined_call_operand.vmem [shape: bf16[256,256], index: 3, kind: input, shape index: {}]   ;;  %s1431_s4 = inlined_call_operand.vmem [shape: f32[1,256], index: 4, kind: input, shape index: {}]   ;;  %s1432_s5 = inlined_call_operand.vmem [shape: bf16[256,128], index: 5, kind: input, shape index: {}]   ;;  %s1433_s6 = inlined_call_operand.vmem [shape: f32[1,128], index: 6, kind: input, shape index: {}]   ;;  %s1434_s7 = inlined_call_operand.hbm [shape: f32[16,128], index: 7, kind: output, shape index: {}]  }
   0x1   :  { %14 = vsyncpa [#allocation3 + $0x1], 0  ;;  %s1162_s24 = smov 0   ;;  %s1164_s25 = smov 0  }
   0x2   :  { %s1166_s26 = smov 0   ;;  %s1168_s27 = smov 0  }
   0x3 LB: > { %s1183_s28 = sadd.s32 4294967295, %s1118_s27   ;;  %s860_s29 = sadd.s32 4294967294, %s1118_s27   ;;  %s1118_s27 = sphi %s1168_s27, %s1440_s27   ;;  %s1114_s26 = sphi %s1166_s26, %s1439_s26   ;;  %s1110_s25 = sphi %s1164_s25, %s1438_s25   ;;  %s1106_s24 = sphi %s1162_s24, %s1437_s24  }
   0x4   : > { %s1187_s30 = sadd.s32 1, %s1118_s27   ;;  %s179_s8 = sadd.s32 1, %s1114_s26 }
   0x5   : > { %s176_s9 = ssub.s32 %s1118_s27, %s1187_s30  ;;  %p189_p0 = scmp.ne.s32.totalorder %s1114_s26, %s1110_s25 }
   0x6   : > { %p177_p1 = scmp.eq.s32.totalorder %s176_s9, 0  ;;  %p190_p2 = scmp.eq.s32.totalorder %s1183_s28, 1 }
   0x7   : > { %p195_p3 = scmp.ne.s32.totalorder %s1110_s25, %s1106_s24  ;;  %p196_p4 = scmp.eq.s32.totalorder %s860_s29, 1 }
   0x8   : > { %s1198_s10 = scalar_select %p177_p1, %s1114_s26, %s179_s8  }
   0x9   : > { %p1200_p5 = por %p190_p2, %p189_p0  ;;  %p1204_p6 = por %p196_p4, %p195_p3 }
   0xa   : > { %p863_p7 = scmp.ge.s32.totalorder %s1118_s27, 1  ;;  %p239_p8 = scmp.lt.s32.totalorder %s1118_s27, 3 }
   0xc   : > { %p240_p9 = pnand %p863_p7, %p239_p8 }
   0xd   : > { %v986_v0 = vld [vmem:[%s1428_s1 + $0x4] ss:$8 sps:$4 sm:$0xff] (!%p240_p9)   ;;  %p270_p10 = scmp.lt.s32.totalorder (!%p240_p9), %s1183_s28, 1  ;;  %v988_v1 = vld [vmem:[%s1428_s1] ss:$8 sps:$4 sm:$0xff] (!%p240_p9)   ;;  %v1120_v2 = vmov (!%p240_p9), 0   ;;  %v283_v51 = vlaneseq (!%p240_p9) }
   0xe   : > { %243 = sbr.rel (%p240_p9) target bundleno = 699 (0x2bb), region = 48  ;;  %349 = vmatprep.mubr.bf16.mxu0 (!%p240_p9), %v1120_v2  ;;  %317 = vmatprep.subr.bf16.mxu0 (!%p240_p9), %v986_v0  ;;  %v989_v3 = vld [vmem:[%s1428_s1 + $0x14] ss:$8 sps:$4 sm:$0xff] (!%p240_p9)   ;;  %v991_v4 = vld [vmem:[%s1428_s1 + $0x10] ss:$8 sps:$4 sm:$0xff] (!%p240_p9)   ;;  %vm313_vm0 = vcmask (!%p240_p9), 261120  }
   0xf   : > { %318 = vmatpush1.bf16.msra.mxu0 (!%p240_p9), %v988_v1  ;;  %v992_v5 = vld [vmem:[%s1430_s3 + $0x4] ss:$8 sps:$4 sm:$0xff] (!%p240_p9)   ;;  %v994_v6 = vld [vmem:[%s1430_s3] ss:$8 sps:$4 sm:$0xff] (!%p240_p9)   ;;  %v995_v7 = vld [vmem:[%s1430_s3 + $0x14] ss:$8 sps:$4 sm:$0xff] (!%p240_p9)  }
  0x10   : > { %319 = vmatprep.subr.bf16.mxu0 (!%p240_p9), %v989_v3  ;;  %566 = vmatprep.subr.bf16.mxu1 (!%p240_p9), %v992_v5  ;;  %v997_v9 = vld [vmem:[%s1430_s3 + $0x10] ss:$8 sps:$4 sm:$0xff] (!%p240_p9)   ;;  %v998_v11 = vld [vmem:[%s1430_s3 + $0x24] ss:$8 sps:$4 sm:$0xff] (!%p240_p9)   ;;  %v1000_v12 = vld [vmem:[%s1430_s3 + $0x20] ss:$8 sps:$4 sm:$0xff] (!%p240_p9)  }
  0x11   : > { %567 = vmatpush1.bf16.msra.mxu1 (!%p240_p9), %v994_v6  ;;  %v1001_v13 = vld [vmem:[%s1430_s3 + $0x34] ss:$8 sps:$4 sm:$0xff] (!%p240_p9)   ;;  %v1003_v14 = vld [vmem:[%s1430_s3 + $0x30] ss:$8 sps:$4 sm:$0xff] (!%p240_p9)   ;;  %v1004_v15 = vld [vmem:[%s1430_s3 + $0x44] ss:$8 sps:$4 sm:$0xff] (!%p240_p9)  }
  0x12   : > { %568 = vmatprep.subr.bf16.mxu1 (!%p240_p9), %v995_v7  ;;  %v1006_v16 = vld [vmem:[%s1430_s3 + $0x40] ss:$8 sps:$4 sm:$0xff] (!%p240_p9)   ;;  %v1007_v17 = vld [vmem:[%s1430_s3 + $0x54] ss:$8 sps:$4 sm:$0xff] (!%p240_p9)   ;;  %v1009_v18 = vld [vmem:[%s1430_s3 + $0x50] ss:$8 sps:$4 sm:$0xff] (!%p240_p9)  }
  0x13   : > { %320 = vmatpush1.bf16.msra.mxu0 (!%p240_p9), %v991_v4  ;;  %v1010_v19 = vld [vmem:[%s1430_s3 + $0x64] ss:$8 sps:$4 sm:$0xff] (!%p240_p9)   ;;  %v1012_v20 = vld [vmem:[%s1430_s3 + $0x60] ss:$8 sps:$4 sm:$0xff] (!%p240_p9)   ;;  %v1013_v21 = vld [vmem:[%s1430_s3 + $0x74] ss:$8 sps:$4 sm:$0xff] (!%p240_p9)  }
  0x14   : > { %v1015_v22 = vld [vmem:[%s1430_s3 + $0x70] ss:$8 sps:$4 sm:$0xff] (!%p240_p9)   ;;  %v1016_v23 = vld [vmem:[%s1430_s3 + $0x84] ss:$8 sps:$4 sm:$0xff] (!%p240_p9)   ;;  %v1018_v24 = vld [vmem:[%s1430_s3 + $0x80] ss:$8 sps:$4 sm:$0xff] (!%p240_p9)  }
  0x15   : > { %s271_s21 = scalar_select %p270_p10, %s1183_s28, 1  ;;  %569 = vmatpush1.bf16.msra.mxu1 %v997_v9  ;;  %v1019_v25 = vld [vmem:[%s1430_s3 + $0x94] ss:$8 sps:$4 sm:$0xff]   ;;  %v1021_v26 = vld [vmem:[%s1430_s3 + $0x90] ss:$8 sps:$4 sm:$0xff]   ;;  %v1040_v39 = vld [vmem:[%s1432_s5 + $0x40] sm:$0xff]  }
  0x16   : > { %570 = vmatprep.subr.bf16.mxu1 %v998_v11  ;;  %v1022_v27 = vld [vmem:[%s1430_s3 + $0xa4] ss:$8 sps:$4 sm:$0xff]   ;;  %v1024_v28 = vld [vmem:[%s1430_s3 + $0xa0] ss:$8 sps:$4 sm:$0xff]   ;;  %v1025_v29 = vld [vmem:[%s1430_s3 + $0xb4] ss:$8 sps:$4 sm:$0xff]   ;;  %924 = vmatprep.subr.bf16.mxu0 %v1040_v39 }
  0x17   : > { %s865_s9 = sshll.u32 %s271_s21, 3  ;;  %v1027_v30 = vld [vmem:[%s1430_s3 + $0xb0] ss:$8 sps:$4 sm:$0xff]   ;;  %v1028_v31 = vld [vmem:[%s1430_s3 + $0xc4] ss:$8 sps:$4 sm:$0xff]   ;;  %v284_v52 = vshrl.u32 %v283_v51, 7 }
  0x18   : > { %s273_s17 = scalar_lea.vmem %s1427_s0, %s865_s9  ;;  %v1030_v32 = vld [vmem:[%s1430_s3 + $0xc0] ss:$8 sps:$4 sm:$0xff]   ;;  %v1031_v33 = vld [vmem:[%s1430_s3 + $0xd4] ss:$8 sps:$4 sm:$0xff]   ;;  %v1033_v34 = vld [vmem:[%s1430_s3 + $0xd0] ss:$8 sps:$4 sm:$0xff]  }
  0x19   : > { %v275_v8 = vld [vmem:[%s273_s17] sm:$0xff]  ;;  %571 = vmatpush1.bf16.msra.mxu1 %v1000_v12  ;;  %v1037_v37 = vld [vmem:[%s1430_s3 + $0xf4] ss:$8 sps:$4 sm:$0xff]   ;;  %v1039_v38 = vld [vmem:[%s1430_s3 + $0xf0] ss:$8 sps:$4 sm:$0xff]   ;;  %v285_v53 = vsub.s32 0, %v284_v52 }
  0x1a   : > { %v276_v10 = vpack.c.bf16 %v275_v8, %v275_v8  ;;  %572 = vmatprep.subr.bf16.mxu1 %v1001_v13  ;;  %v1034_v35 = vld [vmem:[%s1430_s3 + $0xe4] ss:$8 sps:$4 sm:$0xff]   ;;  %v1036_v36 = vld [vmem:[%s1430_s3 + $0xe0] ss:$8 sps:$4 sm:$0xff]   ;;  %v1044_v43 = vld [vmem:[%s1432_s5 + $0x50] sm:$0xff]   ;;  %v289_v55 = vsub.s32 1, %v284_v52 }
  0x1b   : > { %v1041_v40 = vld [vmem:[%s1432_s5] sm:$0xff]   ;;  %v1042_v41 = vld [vmem:[%s1432_s5 + $0x48] sm:$0xff]   ;;  %v1045_v44 = vld [vmem:[%s1432_s5 + $0x10] sm:$0xff]   ;;  %s267_s14 = sand.u32 1, %s1110_s25   ;;  %s921_s18 = sshll.u32 %s1183_s28, 7 }
  0x1c   : > { %870 = vmatmul.mubr.msk.bf16.vlgmr.msra.gmra.mrb[0].mxu0 %vm313_vm0, %v276_v10  ;;  %v1043_v42 = vld [vmem:[%s1432_s5 + $0x8] sm:$0xff]   ;;  %v1046_v45 = vld [vmem:[%s1432_s5 + $0x58] sm:$0xff]   ;;  %v1048_v47 = vld [vmem:[%s1432_s5 + $0x60] sm:$0xff]   ;;  %s864_s15 = sshll.u32 %s267_s14, 3  ;;  %s1385_s23 = scalar_lea.hbm %s1434_s7, %s921_s18 }
  0x1d   : > { %573 = vmatpush1.bf16.msra.mxu1 %v1003_v14  ;;  %925 = vmatpush3.bf16.msra.mxu0 %v1041_v40  ;;  %v1047_v46 = vld [vmem:[%s1432_s5 + $0x18] sm:$0xff]   ;;  %v1049_v48 = vld [vmem:[%s1432_s5 + $0x20] sm:$0xff]   ;;  %v1050_v49 = vld [vmem:[%s1432_s5 + $0x68] sm:$0xff]   ;;  %s269_s19 = scalar_lea.vmem [#allocation2], %s864_s15  ;;  %s788_s29 = scalar_lea.sflag [#allocation3], %s267_s14 }
  0x1e   : > { %574 = vmatprep.subr.bf16.mxu1 %v1004_v15  ;;  %926 = vmatprep.subr.bf16.mxu0 %v1042_v41  ;;  %v1051_v50 = vld [vmem:[%s1432_s5 + $0x28] sm:$0xff]   ;;  %v281_v54 = vld [vmem:[%s1429_s2] sm:$0x3]  ;;  %v1052_v4 = vld [vmem:[%s1432_s5 + $0x70] sm:$0xff]   ;;  %s801_s20 = sshll.u32 %s269_s19, 4  ;;  %s1121_s28 = smov [#allocation2]   ;;  %s1387_s20 = int_to_ptr.vmem [resolvable:$true] %s801_s20 }
  0x1f   : > { %v286_v56 = vrot.slane %v281_v54, %v285_v53  ;;  %v290_v57 = vrot.slane %v281_v54, %v289_v55  ;;  %v1053_v5 = vld [vmem:[%s1432_s5 + $0x30] sm:$0xff]   ;;  %v1054_v6 = vld [vmem:[%s1432_s5 + $0x78] sm:$0xff]   ;;  %v394_v8 = vld [vmem:[%s1431_s4] sm:$0x3]  ;;  %s1056_s8 = scalar_lea.vmem %s1387_s20, 128  ;;  %s1060_s9 = sshll.u32 %s1121_s28, 4  ;;  %s1061_s9 = int_to_ptr.vmem [resolvable:$false] %s1060_s9 }
  0x20   : > { %v1055_v7 = vld [vmem:[%s1432_s5 + $0x38] sm:$0xff]   ;;  %v399_v9 = vrot.slane %v394_v8, %v285_v53  ;;  %v403_v10 = vrot.slane %v394_v8, %v289_v55  ;;  %p1057_p11 = scmp.ne.s32.totalorder %s1387_s20, %s1056_s8  ;;  %s1062_s13 = scalar_lea.vmem %s1061_s9, 256 }
  0x21   : > { %575 = vmatpush1.bf16.msra.mxu1 %v1006_v16  ;;  %927 = vmatpush3.bf16.msra.mxu0 %v1043_v42  ;;  %p1063_p0 = scmp.lt.s32.totalorder %s1387_s20, %s1061_s9  ;;  %p1064_p1 = scmp.lt.s32.totalorder %s1062_s13, %s1056_s8 }
  0x22   : > { %576 = vmatprep.subr.bf16.mxu1 %v1007_v17  ;;  %928 = vmatprep.subr.bf16.mxu0 %v1044_v43  ;;  %p1058_p12 = pnand %p1057_p11, %p1200_p5 }
  0x23   : > { %p1065_p2 = por %p1064_p1, %p1063_p0 }
  0x24   : > { %p1059_p13 = pneg %p1058_p12 }
  0x25   : > { %577 = vmatpush1.bf16.msra.mxu1 %v1009_v18  ;;  %929 = vmatpush3.bf16.msra.mxu0 %v1045_v44 }
  0x26   : > { %578 = vmatprep.subr.bf16.mxu1 %v1010_v19  ;;  %930 = vmatprep.subr.bf16.mxu0 %v1046_v45  ;;  %p1066_p3 = pnand %p1065_p2, %p1059_p13 }
  0x29   : > { %579 = vmatpush1.bf16.msra.mxu1 %v1012_v20  ;;  %931 = vmatpush3.bf16.msra.mxu0 %v1047_v46 }
  0x2a   : > { %580 = vmatprep.subr.bf16.mxu1 %v1013_v21  ;;  %932 = vmatprep.subr.bf16.mxu0 %v1048_v47 }
  0x2d   : > { %581 = vmatpush1.bf16.msra.mxu1 %v1015_v22  ;;  %933 = vmatpush3.bf16.msra.mxu0 %v1049_v48  ;;  %v903_v22 = vld [vmem:[%s1433_s6] ss:$0 sm:$0xff] }
  0x2e   : > { %582 = vmatprep.subr.bf16.mxu1 %v1016_v23  ;;  %934 = vmatprep.subr.bf16.mxu0 %v1050_v49 }
  0x31   : > { %583 = vmatpush1.bf16.msra.mxu1 %v1018_v24  ;;  %935 = vmatpush3.bf16.msra.mxu0 %v1051_v50 }
  0x32   : > { %584 = vmatprep.subr.bf16.mxu1 %v1019_v25  ;;  %936 = vmatprep.subr.bf16.mxu0 %v1052_v4 }
  0x35   : > { %585 = vmatpush1.bf16.msra.mxu1 %v1021_v26  ;;  %937 = vmatpush3.bf16.msra.mxu0 %v1053_v5 }
  0x36   : > { %586 = vmatprep.subr.bf16.mxu1 %v1022_v27  ;;  %938 = vmatprep.subr.bf16.mxu0 %v1054_v6 }
  0x39   : > { %587 = vmatpush1.bf16.msra.mxu1 %v1024_v28  ;;  %939 = vmatpush3.bf16.msra.mxu0 %v1055_v7 }
  0x3a   : > { %588 = vmatprep.subr.bf16.mxu1 %v1025_v29 }
  0x3d   : > { %589 = vmatpush1.bf16.msra.mxu1 %v1027_v30 }
  0x3e   : > { %590 = vmatprep.subr.bf16.mxu1 %v1028_v31 }
  0x41   : > { %591 = vmatpush1.bf16.msra.mxu1 %v1030_v32 }
  0x42   : > { %592 = vmatprep.subr.bf16.mxu1 %v1031_v33 }
  0x45   : > { %593 = vmatpush1.bf16.msra.mxu1 %v1033_v34 }
  0x46   : > { %594 = vmatprep.subr.bf16.mxu1 %v1034_v35 }
  0x49   : > { %595 = vmatpush1.bf16.msra.mxu1 %v1036_v36 }
  0x4a   : > { %596 = vmatprep.subr.bf16.mxu1 %v1037_v37 }
  0x4d   : > { %597 = vmatpush1.bf16.msra.mxu1 %v1039_v38 }
  0xef   : > { %v351_v58 = vpop.f32.mrb[0].mxu0 }
  0xf0   : > { %v352_v59 = vadd.f32 %v351_v58, %v286_v56  ;;  %v353_v60 = vpop.f32.mrb[1].mxu0 }
  0xf1   : > { %v354_v61 = vadd.f32 %v353_v60, %v290_v57  ;;  %v355_v62 = vpop.f32.mrb[2].mxu0 }
  0xf2   : > { %v358_v63 = vmax.f32 %v352_v59, 0.0  ;;  %v356_v0 = vpop.f32.mrb[3].mxu0 }
  0xf3   : > { %v359_v1 = vmax.f32 %v354_v61, 0.0 }
  0xf4   : > { %v360_v3 = vpack.c.bf16 %v358_v63, %v358_v63 }
  0xf5   : > { %v361_v2 = vpack.c.bf16 %v359_v1, %v359_v1 }
  0xf7   : > { %598 = vmatprep.mubr.bf16.mxu1 %v361_v2 }
  0xf8   : > { %599 = vmatmul.mubr.bf16.vlgmr.msra.gmra.mrb[0].mxu1 %v360_v3 }
 0x1cb   : > { %v600_v11 = vpop.f32.mrb[0].mxu1 }
 0x1cc   : > { %v601_v12 = vadd.f32 %v600_v11, %v399_v9  ;;  %v602_v13 = vpop.f32.mrb[1].mxu1 }
 0x1cd   : > { %v603_v14 = vadd.f32 %v602_v13, %v403_v10  ;;  %v604_v15 = vpop.f32.mrb[2].mxu1 }
 0x1ce   : > { %v607_v16 = vmax.f32 %v601_v12, 0.0  ;;  %v605_v17 = vpop.f32.mrb[3].mxu1 }
 0x1cf   : > { %v608_v18 = vmax.f32 %v603_v14, 0.0 }
 0x1d0   : > { %v609_v20 = vpack.c.bf16 %v607_v16, %v607_v16 }
 0x1d1   : > { %v610_v19 = vpack.c.bf16 %v608_v18, %v608_v18 }
 0x1d3   : > { %778 = vmatprep.mubr.bf16.mxu0 %v610_v19 }
 0x1d4   : > { %779 = vmatmul.mubr.bf16.vlgmr.msra.gmra.mrb[4].mxu0 %v609_v20 }
 0x2a7   : > { %v940_v21 = vpop.f32.mrb[4].mxu0 }
 0x2a8   : > { %v941_v23 = vpop.f32.mrb[5].mxu0 }
 0x2a9   : > { %v942_v24 = vadd.f32 %v941_v23, %v940_v21  ;;  %v943_v25 = vpop.f32.mrb[6].mxu0 }
 0x2aa   : > { %v944_v26 = vpop.f32.mrb[7].mxu0 }
 0x2ab   : > { %v781_v27 = vadd.f32 %v942_v24, %v903_v22 }
 0x2ad   : > { %786 = vst [vmem:[%s269_s19] sm:$0xff] %v781_v27 }
 0x2ae   : > { %1069 = shalt.err (!%p1066_p3)
}
 0x2af   : > { %s1070_s14 = scalar_lea.hbm %s1385_s23, 128  ;;  %s1074_s17 = scalar_lea.hbm %s1434_s7, 256 }
 0x2b0   : > { %p1071_p4 = scmp.ne.s32.totalorder %s1385_s23, %s1070_s14  ;;  %p1075_p9 = scmp.lt.u32.totalorder %s1385_s23, %s1434_s7 }
 0x2b1   : > { %p1076_p10 = scmp.lt.u32.totalorder %s1074_s17, %s1070_s14  ;;  %p1078_p12 = scmp.lt.u32.totalorder %s1070_s14, %s1385_s23 }
 0x2b2   : > { %p1072_p7 = pnand %p1071_p4, %p1200_p5 }
 0x2b3   : > { %p1077_p11 = por %p1076_p10, %p1075_p9 }
 0x2b4   : > { %p1073_p8 = pneg %p1072_p7 }
 0x2b5   : > { %p1079_p13 = por %p1078_p12, %p1077_p11 }
 0x2b7   : > { %p1080_p0 = pnand %p1079_p13, %p1073_p8 }
 0x2b9   : > { %1083 = shalt.err (!%p1080_p0)
}
 0x2ba   : > { %946 = dma.vmem_to_hbm [thread:$0]  (%p1200_p5), %s1387_s20, 128, %s1385_s23, %s788_s29  }
 0x2bb PF: > { %p952_p1 = scmp.ge.s32.totalorder %s1118_s27, 2  ;;  %s813_s21 = sand.u32 1, %s1106_s24  }
 0x2bc   : > { %s814_s22 = scalar_lea.sflag [#allocation3], %s813_s21 }
 0x2bd   : > { %p949_p2 = pnand %p952_p1, %p1204_p6 }
 0x2bf   : > { %1101 = dma.done.wait (!%p949_p2), %s814_s22, 128  }
 0x2c0   : > { %1103 = vsyncadd (!%p949_p2), %s814_s22, 4294967168  ;;  %p17_p3 = scmp.ge.s32.totalorder %s1187_s30, 4   ;;  %s1437_s24 = smov %s1110_s25 }
 0x2c1   : > { %s1438_s25 = smov %s1114_s26  ;;  %s1439_s26 = smov %s1198_s10 }
 0x2c2   : > { %s1440_s27 = smov %s1187_s30  ;;  %19 = sbr.rel (!%p17_p3) target bundleno = 3 (0x3), region = 83 }
 0x2c9   :  { %819 = vsyncpa [#allocation3], 1 }
 0x2ca   :  { %821 = vsyncpa [#allocation3 + $0x1], 1 }

</bundles_post_ra>
